<compile_context>
chip_gen: v7x
topology: tpu7x:2x2x1
jax: 0.10.0
libtpu: 0.0.40
codegen_flags: <defaults>
</compile_context>

<pallas_src>
import functools

import jax
import jax.numpy as jnp
from jax.experimental import pallas as pl
from jax.experimental.pallas import tpu as pltpu

EPS = 1e-5  # PyTorch BatchNorm1d default


def _softplus(v):
    # Matches torch.nn.Softplus(beta=1, threshold=20)
    return jnp.where(v > 20.0, v, jnp.log1p(jnp.exp(jnp.minimum(v, 20.0))))


def _project_kernel(x_ref, wn_ref, pnbr_ref):
    """Pass 0: pnbr = x @ W_nbr, cached once as bf16 for the gather."""
    pnbr_ref[...] = jnp.dot(
        x_ref[...], wn_ref[...], preferred_element_type=jnp.float32
    ).astype(pnbr_ref.dtype)


def _gated_preact(tile_n, m, x_ref, idx_ref, bond_ref,
                  ws_ref, wb_ref, bias_ref, pnbr_ref):
    """Pre-BN1 activation for one atom tile, shape (tile_n, M, 2A), f32.

    g[i, j, :] = x[i] @ W_self + x[idx[i, j]] @ W_nbr + bond[i, j] @ W_bond + b
    Neighbour rows are selected from the cached projection pnbr = x @ W_nbr
    with a one-hot matmul in bf16 (exact row selection, runs on the MXU).
    """
    n_total = pnbr_ref.shape[0]
    two_a = ws_ref.shape[1]

    p_self = jnp.dot(x_ref[...], ws_ref[...],
                     preferred_element_type=jnp.float32) + bias_ref[0:1, :]
    p_bond = jnp.dot(bond_ref[...], wb_ref[...],
                     preferred_element_type=jnp.float32)            # (tnm, 2A)

    # TODO(synk): O(tnm * N) compare + matmul; replace with a DMA gather for
    # large N (scalar-prefetched idx in SMEM, tiled pnbr cache).
    onehot = (idx_ref[...] ==
              jax.lax.broadcasted_iota(jnp.int32, (tile_n * m, n_total), 1)
              ).astype(jnp.bfloat16)                                 # (tnm, N)
    p_nbr = jnp.dot(onehot, pnbr_ref[...],
                    preferred_element_type=jnp.float32)              # (tnm, 2A)

    g = (p_nbr + p_bond).reshape(tile_n, m, two_a)
    return g + p_self.reshape(tile_n, 1, two_a)                      # (tn,M,2A)


def _bn1_stats_kernel(tile_n, m,
                      x_ref, idx_ref, bond_ref,
                      ws_ref, wb_ref, bias_ref, pnbr_ref,
                      stats1_ref):
    """Pass 1: accumulate per-channel sum / sumsq of the pre-BN1 activation."""
    @pl.when(pl.program_id(0) == 0)
    def _():
        stats1_ref[...] = jnp.zeros_like(stats1_ref)

    g = _gated_preact(tile_n, m, x_ref, idx_ref, bond_ref,
                      ws_ref, wb_ref, bias_ref, pnbr_ref)
    stats1_ref[0:1, :] += jnp.sum(jnp.sum(g, axis=1), axis=0, keepdims=True)
    stats1_ref[1:2, :] += jnp.sum(jnp.sum(g * g, axis=1), axis=0, keepdims=True)


def _conv_kernel(tile_n, m,
                 x_ref, idx_ref, bond_ref,
                 ws_ref, wb_ref, bias_ref, pnbr_ref, affine1_ref,
                 s_ref, stats2_ref):
    """Pass 2: apply bn1 + gating, sum over neighbours, accumulate bn2 stats."""
    a = s_ref.shape[1]

    @pl.when(pl.program_id(0) == 0)
    def _():
        stats2_ref[...] = jnp.zeros_like(stats2_ref)

    g = _gated_preact(tile_n, m, x_ref, idx_ref, bond_ref,
                      ws_ref, wb_ref, bias_ref, pnbr_ref)
    # bn1 finalised in the wrapper: affine1 = [scale1; shift1], shape (2, 2A).
    h = g * affine1_ref[0:1, :] + affine1_ref[1:2, :]   # (tn, M, 2A)
    gate = jax.nn.sigmoid(h[:, :, :a])                  # nbr_filter
    core = _softplus(h[:, :, a:])                       # nbr_core (softplus1)
    s = jnp.sum(gate * core, axis=1)                    # (tn, A)

    s_ref[...] = s
    stats2_ref[0:1, :] += jnp.sum(s, axis=0, keepdims=True)
    stats2_ref[1:2, :] += jnp.sum(s * s, axis=0, keepdims=True)


def _bn2_residual_kernel(x_ref, s_ref, affine2_ref, out_ref):
    """Pass 3: bn2, softplus(x + .), identity skip (lane-dense layout)."""
    x = x_ref[...]
    out_ref[...] = _softplus(
        x + s_ref[...] * affine2_ref[0:1, :] + affine2_ref[1:2, :]) + x


def residual_block_forward(x, nbr_fea, nbr_fea_idx, params, *, tile_n=128):
    n, a = x.shape
    m = nbr_fea_idx.shape[1]
    b = nbr_fea.shape[-1]
    tile_n = min(tile_n, n)
    # Padded rows would corrupt the BatchNorm batch statistics, so require
    # exact tiling instead of silently padding.
    assert n % tile_n == 0, "pad the atom dimension to a multiple of tile_n"
    grid = (n // tile_n,)
    tnm = tile_n * m

    # bf16 MXU operands (accumulation is f32 in-kernel); BN math stays f32.
    x_bf = x.astype(jnp.bfloat16)                                    # (N, A)
    bond = nbr_fea.reshape(n * m, b).astype(jnp.bfloat16)            # (N*M, B)
    # TODO(synk): (tnm, 1) int32 pads to 128 lanes per DMA; move the indices
    # to scalar-prefetch SMEM once the gather is DMA-based.
    idx = nbr_fea_idx.reshape(n * m, 1).astype(jnp.int32)            # (N*M, 1)

    ws = params["w_self"].astype(jnp.bfloat16)                       # (A, 2A)
    wn = params["w_nbr"].astype(jnp.bfloat16)                        # (A, 2A)
    wb = params["w_bond"].astype(jnp.bfloat16)                       # (B, 2A)
    bias = params["bias"].reshape(1, 2 * a).astype(jnp.float32)      # (1, 2A)

    row_spec = pl.BlockSpec((tile_n, a), lambda i: (i, 0))
    idx_spec = pl.BlockSpec((tnm, 1), lambda i: (i, 0))
    bond_spec = pl.BlockSpec((tnm, b), lambda i: (i, 0))
    ws_spec = pl.BlockSpec((a, 2 * a), lambda i: (0, 0))
    wn_spec = pl.BlockSpec((a, 2 * a), lambda i: (0, 0))
    wb_spec = pl.BlockSpec((b, 2 * a), lambda i: (0, 0))
    bias_spec = pl.BlockSpec((1, 2 * a), lambda i: (0, 0))
    pnbr_full_spec = pl.BlockSpec((n, 2 * a), lambda i: (0, 0))   # resident
    pnbr_row_spec = pl.BlockSpec((tile_n, 2 * a), lambda i: (i, 0))
    stats1_spec = pl.BlockSpec((2, 2 * a), lambda i: (0, 0))
    affine1_spec = pl.BlockSpec((2, 2 * a), lambda i: (0, 0))
    stats2_spec = pl.BlockSpec((2, a), lambda i: (0, 0))

    # 32 MiB keeps headroom on all generations (v7x has 64 MiB/TC physical).
    seq_params = pltpu.CompilerParams(
        dimension_semantics=("arbitrary",),      # stats accumulate across tiles
        vmem_limit_bytes=32 * 1024 * 1024)
    par_params = pltpu.CompilerParams(
        dimension_semantics=("parallel",),
        vmem_limit_bytes=32 * 1024 * 1024)

    # Pass 0: neighbour projection cache pnbr = x @ W_nbr (bf16).
    pnbr = pl.pallas_call(
        _project_kernel,
        grid=grid,
        in_specs=[row_spec, wn_spec],
        out_specs=pnbr_row_spec,
        out_shape=jax.ShapeDtypeStruct((n, 2 * a), jnp.bfloat16),
        compiler_params=par_params,
    )(x_bf, wn)

    # Pass 1: bn1 batch statistics of the pre-activation (training-mode BN:
    # per-channel sum / sumsq accumulated across tiles in f32).
    stats1 = pl.pallas_call(
        functools.partial(_bn1_stats_kernel, tile_n, m),
        grid=grid,
        in_specs=[row_spec, idx_spec, bond_spec, ws_spec, wb_spec,
                  bias_spec, pnbr_full_spec],
        out_specs=stats1_spec,
        out_shape=jax.ShapeDtypeStruct((2, 2 * a), jnp.float32),
        compiler_params=seq_params,
    )(x_bf, idx, bond, ws, wb, bias, pnbr)

    # Finalise bn1 (batch mean, biased variance) in the wrapper; clamp the
    # variance against f32 cancellation going slightly negative.
    inv1 = 1.0 / float(n * m)
    mean1 = stats1[0] * inv1
    var1 = jnp.maximum(stats1[1] * inv1 - mean1 * mean1, 0.0)
    scale1 = params["gamma1"] * jax.lax.rsqrt(var1 + EPS)
    shift1 = params["beta1"] - mean1 * scale1
    affine1 = jnp.stack([scale1, shift1]).astype(jnp.float32)        # (2, 2A)

    # Pass 2: recompute the pre-activation (cheaper than round-tripping the
    # (N, M, 2A) tensor through HBM at these sizes), apply bn1 + gating,
    # sum over neighbours, accumulate bn2 batch statistics.
    s, stats2 = pl.pallas_call(
        functools.partial(_conv_kernel, tile_n, m),
        grid=grid,
        in_specs=[row_spec, idx_spec, bond_spec, ws_spec, wb_spec,
                  bias_spec, pnbr_full_spec, affine1_spec],
        out_specs=[row_spec, stats2_spec],
        out_shape=(jax.ShapeDtypeStruct((n, a), jnp.float32),
                   jax.ShapeDtypeStruct((2, a), jnp.float32)),
        compiler_params=seq_params,
    )(x_bf, idx, bond, ws, wb, bias, pnbr, affine1)

    # Finalise bn2 in the wrapper.
    inv2 = 1.0 / float(n)
    mean2 = stats2[0] * inv2
    var2 = jnp.maximum(stats2[1] * inv2 - mean2 * mean2, 0.0)
    scale2 = params["gamma2"] * jax.lax.rsqrt(var2 + EPS)
    shift2 = params["beta2"] - mean2 * scale2

    # Pass 3: bn2 + softplus(x + .) + identity skip.  Present a lane-dense
    # output slab: fold 4 atom rows per output row when possible (pure layout
    # plumbing; per-channel vectors are tiled to match the folded layout).
    f = 4 if (n % 4 == 0) else 1
    rows = n // f
    x3 = x.astype(jnp.float32).reshape(rows, f * a)
    s3 = s.reshape(rows, f * a)
    affine2 = jnp.stack([jnp.tile(scale2, f),
                         jnp.tile(shift2, f)]).astype(jnp.float32)   # (2, f*A)

    tile_r = min(rows, 2048)
    out3_spec = pl.BlockSpec((tile_r, f * a), lambda i: (i, 0))
    affine2_spec = pl.BlockSpec((2, f * a), lambda i: (0, 0))
    out = pl.pallas_call(
        _bn2_residual_kernel,
        grid=(pl.cdiv(rows, tile_r),),
        in_specs=[out3_spec, out3_spec, affine2_spec],
        out_specs=out3_spec,
        out_shape=jax.ShapeDtypeStruct((rows, f * a), jnp.float32),
        compiler_params=par_params,
    )(x3, s3, affine2)
    return out.reshape(n, a)


def init_params(key, atom_fea_len, nbr_fea_len):
    """Deterministic synthetic parameters (same shapes as the PyTorch module)."""
    a, b = atom_fea_len, nbr_fea_len
    k1, k2 = jax.random.split(key)
    # fc_full: nn.Linear(2A+B, 2A); stored as W^T with shape (2A+B, 2A).
    wt = jax.random.normal(k1, (2 * a + b, 2 * a), jnp.float32) * 0.1
    bias = jax.random.normal(k2, (2 * a,), jnp.float32) * 0.1
    return dict(
        # input row groups of W^T: [:A] self atom, [A:2A] neighbour atom, [2A:] bond
        # output columns kept fused: [:A] filter half, [A:] core half.
        w_self=wt[:a, :], w_nbr=wt[a:2 * a, :], w_bond=wt[2 * a:, :],
        bias=bias,
        # Fresh nn.BatchNorm1d: weight = 1, bias = 0.
        gamma1=jnp.ones((2 * a,), jnp.float32),
        beta1=jnp.zeros((2 * a,), jnp.float32),
        gamma2=jnp.ones((a,), jnp.float32),
        beta2=jnp.zeros((a,), jnp.float32),
    )


if __name__ == "__main__":
    key = jax.random.PRNGKey(0)
    kx, kb, ki, kp = jax.random.split(key, 4)

    # N atoms, M neighbours, A atom features, B bond features.
    N, M, A, B = 64, 8, 32, 16
    x = jax.random.normal(kx, (N, A), jnp.float32)
    nbr_fea = jax.random.normal(kb, (N, M, B), jnp.float32)
    nbr_fea_idx = jax.random.randint(ki, (N, M), 0, N, dtype=jnp.int32)
    params = init_params(kp, A, B)

    out = residual_block_forward(x, nbr_fea, nbr_fea_idx, params, tile_n=128)
    jax.block_until_ready(out)
    assert out.shape == (N, A) and out.dtype == jnp.float32
    assert bool(jnp.all(jnp.isfinite(out)))
    print("KERNEL_OK")
</pallas_src>

<mosaic_0001>
module attributes {stable_mosaic.version = 11 : i64} {
  func.func @_project_kernel(%arg0: i32, %arg1: memref<64x32xbf16, #tpu.memory_space<vmem>>, %arg2: memref<32x64xbf16, #tpu.memory_space<vmem>>, %arg3: memref<64x64xbf16, #tpu.memory_space<vmem>>) attributes {dimension_semantics = [#tpu.dimension_semantics<parallel>], iteration_bounds = array<i64: 1>, scalar_prefetch = 0 : i64, scratch_operands = 0 : i64, tpu.core_type = #tpu.core_type<tc>, window_params = [{transform_indices = @transform_0, window_bounds = array<i64: 64, 32>}, {pipeline_mode = #tpu.pipeline_mode<synchronous>, transform_indices = @transform_1, window_bounds = array<i64: 32, 64>}, {transform_indices = @transform_2, window_bounds = array<i64: 64, 64>}]} {
    %c0 = arith.constant 0 : index
    %c0_0 = arith.constant 0 : index
    %0 = vector.load %arg1[%c0, %c0_0] : memref<64x32xbf16, #tpu.memory_space<vmem>>, vector<64x32xbf16>
    %c0_1 = arith.constant 0 : index
    %c0_2 = arith.constant 0 : index
    %1 = vector.load %arg2[%c0_1, %c0_2] : memref<32x64xbf16, #tpu.memory_space<vmem>>, vector<32x64xbf16>
    %cst = arith.constant dense<0.000000e+00> : vector<64x64xf32>
    %2 = tpu.matmul %0, %1, %cst {dimension_numbers = #tpu.dot_dimension_numbers<[1], [0], [0], [1], [0, 0, 1, 1], [], []>} : vector<64x32xbf16>, vector<32x64xbf16>, vector<64x64xf32> -> vector<64x64xf32>
    %3 = arith.truncf %2 : vector<64x64xf32> to vector<64x64xbf16>
    %c0_3 = arith.constant 0 : index
    %c0_4 = arith.constant 0 : index
    %4 = vector.load %arg3[%c0_3, %c0_4] : memref<64x64xbf16, #tpu.memory_space<vmem>>, vector<64x64xbf16>
    tpu.vector_store %arg3[%c0_3, %c0_4], %3 {strides = array<i32>} : memref<64x64xbf16, #tpu.memory_space<vmem>>, vector<64x64xbf16>,
    return
  }
  func.func @transform_0(%arg0: i32) -> (i32, i32) {
    %c0_i32 = arith.constant 0 : i32
    %c0_i32_0 = arith.constant 0 : i32
    return %arg0, %c0_i32 : i32, i32
  }
  func.func @transform_1(%arg0: i32) -> (i32, i32) {
    %c0_i32 = arith.constant 0 : i32
    %c0_i32_0 = arith.constant 0 : i32
    %c0_i32_1 = arith.constant 0 : i32
    return %c0_i32, %c0_i32_0 : i32, i32
  }
  func.func @transform_2(%arg0: i32) -> (i32, i32) {
    %c0_i32 = arith.constant 0 : i32
    %c0_i32_0 = arith.constant 0 : i32
    return %arg0, %c0_i32 : i32, i32
  }
}

</mosaic_0001>

<bundles_post_ra>
// kernel: tpu_custom_call.1
= control target key start
LH: loop header
LB: loop body
LE: loop exit
PB: predicated region body
PF: predicated region fallthrough
CT: control target
= control target key end

     0   :  { %vm57_vm0 = vcmask 261120   ;;  %s329_s0 = inlined_call_operand.vmem [shape: bf16[64,32], index: 0, kind: input, shape index: {}]   ;;  %s330_s1 = inlined_call_operand.vmem [shape: bf16[32,64], index: 1, kind: input, shape index: {}]   ;;  %s331_s2 = inlined_call_operand.hbm [shape: bf16[64,64], index: 2, kind: output, shape index: {}]  }
   0x1   :  { %v243_v0 = vld [vmem:[%s330_s1] sm:$0xff]   ;;  %v244_v1 = vld [vmem:[%s330_s1 + $0x8] sm:$0xff]   ;;  %v246_v3 = vld [vmem:[%s329_s0 + $0x10] sm:$0xff]  }
   0x2   :  { %224 = vmatprep.subr.bf16.mxu0 %v243_v0  ;;  %236 = vmatprep.subr.bf16.mxu1 %v243_v0  ;;  %v245_v2 = vld [vmem:[%s329_s0] sm:$0xff]   ;;  %v247_v4 = vld [vmem:[%s329_s0 + $0x8] sm:$0xff]   ;;  %v248_v5 = vld [vmem:[%s329_s0 + $0x18] sm:$0xff]  }
   0x3   :  { %225 = vmatpush3.bf16.msra.mxu0 %v243_v0  ;;  %238 = vmatpush3.bf16.msra.mxu1 %v243_v0 }
   0x4   :  { %226 = vmatprep.subr.bf16.mxu0 %v244_v1  ;;  %237 = vmatprep.subr.bf16.mxu1 %v244_v1 }
   0x5   :  { %228 = vmatprep.mubr.msk.bf16.mxu0 %vm57_vm0, %v245_v2  ;;  %232 = vmatprep.mubr.msk.bf16.mxu1 %vm57_vm0, %v246_v3 }
   0x6   :  { %7 = vsyncpa [#allocation3], 0  ;;  %vm167_vm1 = vcmask 519168   ;;  %s273_s20 = smov [#allocation2]  }
   0x7   :  { %227 = vmatpush3.bf16.msra.mxu0 %v244_v1  ;;  %239 = vmatpush3.bf16.msra.mxu1 %v244_v1  ;;  %s181_s21 = sshll.u32 %s273_s20, 4  ;;  %s182_s21 = int_to_ptr.vmem [resolvable:$true] %s181_s21 }
   0x8   :  { %s249_s0 = scalar_lea.vmem %s182_s21, 512  ;;  %p254_p1 = scmp.lt.s32.totalorder %s182_s21, %s182_s21 }
   0x9   :  { %p250_p0 = scmp.ne.s32.totalorder %s182_s21, %s249_s0  ;;  %p255_p2 = scmp.lt.s32.totalorder %s249_s0, %s249_s0 }
   0xa   :  { %229 = vmatmul.mubr.msk.bf16.vlgmr.msra.gmra.mrb[0].mxu0 %vm57_vm0, %v247_v4  ;;  %233 = vmatmul.mubr.msk.bf16.vlgmr.msra.gmra.mrb[0].mxu1 %vm57_vm0, %v248_v5 }
   0xb   :  { %p256_p3 = por %p255_p2, %p254_p1 }
   0xd   :  { %p257_p4 = pnand %p256_p3, %p250_p0 }
  0xdd   :  { %v230_v6 = vpop.f32.mrb[0].mxu0  ;;  %v234_v7 = vpop.f32.mrb[0].mxu1 }
  0xde   :  { %v212_v8 = vpack.c.bf16 %v230_v6, %v230_v6  ;;  %v216_v9 = vpack.c.bf16 %v234_v7, %v234_v7  ;;  %v104_v10 = vpop.f32.mrb[1].mxu0  ;;  %v120_v11 = vpop.f32.mrb[1].mxu1 }
  0xdf   :  { %v210_v12 = vpack.c.bf16 %v104_v10, %v104_v10  ;;  %v214_v13 = vpack.c.bf16 %v120_v11, %v120_v11  ;;  %v231_v14 = vpop.f32.mrb[2].mxu0  ;;  %v235_v15 = vpop.f32.mrb[2].mxu1 }
  0xe0   :  { %170 = vst.msk [vmem:[#allocation2 + $0x8] sm:$0xf] %vm167_vm1, %v212_v8  ;;  %174 = vst.msk [vmem:[#allocation2 + $0x18] sm:$0xf] %vm167_vm1, %v216_v9  ;;  %v213_v16 = vpack.c.bf16 %v231_v14, %v231_v14  ;;  %v217_v17 = vpack.c.bf16 %v235_v15, %v235_v15  ;;  %v107_v18 = vpop.f32.mrb[3].mxu0  ;;  %v123_v19 = vpop.f32.mrb[3].mxu1 }
  0xe1   :  { %168 = vst.msk [vmem:[#allocation2] sm:$0xf] %vm167_vm1, %v210_v12  ;;  %172 = vst.msk [vmem:[#allocation2 + $0x10] sm:$0xf] %vm167_vm1, %v214_v13  ;;  %v211_v20 = vpack.c.bf16 %v107_v18, %v107_v18  ;;  %v215_v21 = vpack.c.bf16 %v123_v19, %v123_v19 }
  0xe2   :  { %171 = vst.msk [vmem:[#allocation2 + $0xc] sm:$0xf] %vm167_vm1, %v213_v16  ;;  %175 = vst.msk [vmem:[#allocation2 + $0x1c] sm:$0xf] %vm167_vm1, %v217_v17 }
  0xe3   :  { %169 = vst.msk [vmem:[#allocation2 + $0x4] sm:$0xf] %vm167_vm1, %v211_v20  ;;  %173 = vst.msk [vmem:[#allocation2 + $0x14] sm:$0xf] %vm167_vm1, %v215_v21 }
  0xe4   :  { %260 = shalt.err (!%p257_p4)
}
  0xe5   :  { %s261_s24 = scalar_lea.hbm %s331_s2, 512 }
  0xe6   :  { %p262_p5 = scmp.ne.s32.totalorder %s331_s2, %s261_s24  ;;  %p265_p6 = scmp.lt.u32.totalorder %s261_s24, %s331_s2 }
  0xe8   :  { %p267_p7 = pnand %p265_p6, %p262_p5 }
  0xea   :  { %270 = shalt.err (!%p267_p7)
}
  0xeb   :  { %s274_s29 = smov 64   ;;  %s275_s30 = smov 4  }
  0xec   :  { %187 = dma.vmem_to_hbm [thread:$0]  %s182_s21, 512, %s331_s2, [#allocation3], %s274_s29, %s274_s29, %s275_s30  }
  0xed   :  { %271 = dma.done.wait [#allocation3], 512  }
  0xee   :  { %272 = vsyncadd [#allocation3], 4294966784 }
  0xef   :  { %191 = vsyncpa [#allocation3], 1 }

</bundles_post_ra>
